<compile_context>
chip_gen: v7x
topology: tpu7x:2x2x1
jax: 0.10.0
libtpu: 0.0.40
codegen_flags: <defaults>
</compile_context>

<pallas_src>
import jax
import jax.numpy as jnp
from jax.experimental import pallas as pl
from jax.experimental.pallas import tpu as pltpu


def _round_up(x: int, m: int) -> int:
    return ((x + m - 1) // m) * m


def _actor_kernel(x_ref,
                  w1_ref, b1_ref,
                  w2_ref, b2_ref,
                  w3_ref, b3_ref,
                  w4_ref, b4_ref,
                  out_ref):
    compute_dtype = w1_ref.dtype
    # Input arrives f32; cast the tile here (a few VPU pack ops hidden under layer 1).
    x = x_ref[...].astype(compute_dtype)

    # Layer 1: Linear + ReLU   (Dropout(0.2) is identity at inference)
    h = jnp.dot(x, w1_ref[...], preferred_element_type=jnp.float32) + b1_ref[...]
    h = jnp.maximum(h, 0.0).astype(compute_dtype)

    # Layer 2: Linear + ReLU   (Dropout identity)
    h = jnp.dot(h, w2_ref[...], preferred_element_type=jnp.float32) + b2_ref[...]
    h = jnp.maximum(h, 0.0).astype(compute_dtype)

    # Layer 3: Linear + ReLU
    h = jnp.dot(h, w3_ref[...], preferred_element_type=jnp.float32) + b3_ref[...]
    h = jnp.maximum(h, 0.0).astype(compute_dtype)

    # Layer 4: Linear + Softmax(dim=-1).  The padded-action-lane mask (-1e30) is
    # pre-baked into b4, so padded lanes flush to exactly 0 after exp.
    logits = jnp.dot(h, w4_ref[...], preferred_element_type=jnp.float32) + b4_ref[...]
    m = jnp.max(logits, axis=-1, keepdims=True)
    e = jnp.exp(logits - m)
    denom = jnp.sum(e, axis=-1, keepdims=True)
    out_ref[...] = (e * pl.reciprocal(denom, approx=True)).astype(out_ref.dtype)


def prepare_params(params, *, compute_dtype=jnp.bfloat16, mask_value=-1e30):
    """One-time prep: cast weights to the MXU dtype, pad the action dim to a
    lane-dense multiple of 128, and bake the padded-lane mask into the last bias.
    Returns (prepped_params, action_dim)."""
    S, H = params["w1"].shape
    A = params["w4"].shape[1]
    A_pad = _round_up(max(A, 128), 128)

    w4 = jnp.zeros((H, A_pad), compute_dtype).at[:, :A].set(
        params["w4"].astype(compute_dtype))
    b4 = jnp.full((1, A_pad), mask_value, jnp.float32).at[:, :A].set(
        params["b4"].reshape(1, -1).astype(jnp.float32))

    prepped = {
        "w1": params["w1"].astype(compute_dtype),
        "b1": params["b1"].reshape(1, -1).astype(jnp.float32),
        "w2": params["w2"].astype(compute_dtype),
        "b2": params["b2"].reshape(1, -1).astype(jnp.float32),
        "w3": params["w3"].astype(compute_dtype),
        "b3": params["b3"].reshape(1, -1).astype(jnp.float32),
        "w4": w4,
        "b4": b4,
    }
    return prepped, A


def _choose_batch_tile(B: int, tile_b: int):
    """Pick (TB, num_tiles): TB is a sublane multiple, dead-row padding is minimal,
    and there are >= 2 tiles whenever B_pad > 32 so v7x megacore can split the grid."""
    B_pad = _round_up(B, 8)
    if B_pad <= 32:
        return B_pad, 1   # per-step overhead dominates; keep a single tile
    num_tiles = max(2, pl.cdiv(B_pad, tile_b))
    TB = _round_up(pl.cdiv(B_pad, num_tiles), 8)
    num_tiles = pl.cdiv(B_pad, TB)
    return TB, num_tiles


def actor_forward(state, prepped_params, action_dim, *, tile_b: int = 512,
                  out_dtype=jnp.float32):
    """state: [B, state_dim] float32. prepped_params: output of prepare_params()."""
    p = prepped_params
    B, S = state.shape
    H = p["w1"].shape[1]
    A_pad = p["w4"].shape[1]

    TB, num_tiles = _choose_batch_tile(B, tile_b)
    B_total = TB * num_tiles

    # Only materialize a padded copy when the tiling actually needs extra rows.
    if B_total != B:
        x = jnp.zeros((B_total, S), state.dtype).at[:B, :].set(state)
    else:
        x = state

    args = (x, p["w1"], p["b1"], p["w2"], p["b2"], p["w3"], p["b3"], p["w4"], p["b4"])

    # Batch-tiled state/output; weights & biases are grid-invariant (constant
    # index_map -> VMEM-resident, no per-tile re-DMA).
    in_specs = [pl.BlockSpec((TB, S), lambda i: (i, 0))]
    for a in args[1:]:
        in_specs.append(pl.BlockSpec(a.shape, lambda i: (0, 0)))
    out_specs = pl.BlockSpec((TB, A_pad), lambda i: (i, 0))

    w_itemsize = jnp.dtype(p["w1"].dtype).itemsize
    cost = pl.CostEstimate(
        flops=2 * B_total * (S * H + 2 * H * H + H * A_pad),
        transcendentals=B_total * (A_pad + 1),
        bytes_accessed=(B_total * S * jnp.dtype(state.dtype).itemsize
                        + (S * H + 2 * H * H + H * A_pad) * w_itemsize
                        + (3 * H + A_pad) * 4
                        + B_total * A_pad * jnp.dtype(out_dtype).itemsize),
    )

    out_padded = pl.pallas_call(
        _actor_kernel,
        out_shape=jax.ShapeDtypeStruct((B_total, A_pad), out_dtype),
        grid_spec=pltpu.PrefetchScalarGridSpec(
            num_scalar_prefetch=0,
            grid=(num_tiles,),
            in_specs=in_specs,
            out_specs=out_specs,
        ),
        compiler_params=pltpu.CompilerParams(
            dimension_semantics=("parallel",),
        ),
        cost_estimate=cost,
    )(*args)

    return out_padded[:B, :action_dim]


def reference_forward(state, params, compute_dtype=jnp.bfloat16):
    """Pure-JAX reference with the same bf16-in / f32-accumulate numerics."""
    def lin(x, w, b):
        return jnp.dot(x.astype(compute_dtype), w.astype(compute_dtype),
                       preferred_element_type=jnp.float32) + b.astype(jnp.float32)

    h = jnp.maximum(lin(state, params["w1"], params["b1"]), 0.0)
    h = jnp.maximum(lin(h, params["w2"], params["b2"]), 0.0)
    h = jnp.maximum(lin(h, params["w3"], params["b3"]), 0.0)
    logits = lin(h, params["w4"], params["b4"])
    return jax.nn.softmax(logits, axis=-1)


def init_params(key, state_dim, action_dim, hidden_dim):
    """Deterministic synthetic parameters (PyTorch-style uniform fan-in scaling)."""
    dims = [(state_dim, hidden_dim),
            (hidden_dim, hidden_dim),
            (hidden_dim, hidden_dim),
            (hidden_dim, action_dim)]
    params = {}
    for i, (fan_in, fan_out) in enumerate(dims, start=1):
        key, kw, kb = jax.random.split(key, 3)
        bound = 1.0 / jnp.sqrt(jnp.float32(fan_in))
        # stored as [in, out] so the kernel does x @ W (PyTorch weight is [out, in])
        params[f"w{i}"] = jax.random.uniform(
            kw, (fan_in, fan_out), jnp.float32, -bound, bound)
        params[f"b{i}"] = jax.random.uniform(
            kb, (1, fan_out), jnp.float32, -bound, bound)
    return params


if __name__ == "__main__":
    STATE_DIM, ACTION_DIM, HIDDEN_DIM = 16, 8, 256

    root = jax.random.PRNGKey(0)
    kparams, kx_small, kx_mid = jax.random.split(root, 3)
    params = init_params(kparams, STATE_DIM, ACTION_DIM, HIDDEN_DIM)

    # One-time parameter prep (cast/pad/mask) hoisted out of the forward path.
    prepped, action_dim = prepare_params(params)

    # Small batch: single-tile path.
    state_small = jax.random.normal(kx_small, (8, STATE_DIM), jnp.float32)
    probs = actor_forward(state_small, prepped, action_dim)
    jax.block_until_ready(probs)
    ref = reference_forward(state_small, params)
    assert probs.shape == (8, ACTION_DIM)
    # rows sum to ~1 (approx reciprocal in the kernel -> small slack)
    assert jnp.allclose(jnp.sum(probs, axis=-1), 1.0, atol=5e-3)
    assert jnp.allclose(probs, ref, atol=2e-3, rtol=2e-2)

    # Mid batch: exercises the >=2-tile (megacore) path with a padded last tile.
    state_mid = jax.random.normal(kx_mid, (40, STATE_DIM), jnp.float32)
    probs_mid = actor_forward(state_mid, prepped, action_dim)
    jax.block_until_ready(probs_mid)
    ref_mid = reference_forward(state_mid, params)
    assert probs_mid.shape == (40, ACTION_DIM)
    assert jnp.allclose(jnp.sum(probs_mid, axis=-1), 1.0, atol=5e-3)
    assert jnp.allclose(probs_mid, ref_mid, atol=2e-3, rtol=2e-2)

    print("KERNEL_OK")
</pallas_src>

<mosaic_0001>
module attributes {stable_mosaic.version = 11 : i64} {
  func.func @_actor_kernel(%arg0: i32, %arg1: memref<8x16xf32, #tpu.memory_space<vmem>>, %arg2: memref<16x256xbf16, #tpu.memory_space<vmem>>, %arg3: memref<1x256xf32, #tpu.memory_space<vmem>>, %arg4: memref<256x256xbf16, #tpu.memory_space<vmem>>, %arg5: memref<1x256xf32, #tpu.memory_space<vmem>>, %arg6: memref<256x256xbf16, #tpu.memory_space<vmem>>, %arg7: memref<1x256xf32, #tpu.memory_space<vmem>>, %arg8: memref<256x128xbf16, #tpu.memory_space<vmem>>, %arg9: memref<1x128xf32, #tpu.memory_space<vmem>>, %arg10: memref<8x128xf32, #tpu.memory_space<vmem>>) attributes {dimension_semantics = [#tpu.dimension_semantics<parallel>], iteration_bounds = array<i64: 1>, scalar_prefetch = 0 : i64, scratch_operands = 0 : i64, tpu.core_type = #tpu.core_type<tc>, window_params = [{transform_indices = @transform_0, window_bounds = array<i64: 8, 16>}, {pipeline_mode = #tpu.pipeline_mode<synchronous>, transform_indices = @transform_1, window_bounds = array<i64: 16, 256>}, {pipeline_mode = #tpu.pipeline_mode<synchronous>, transform_indices = @transform_2, window_bounds = array<i64: 1, 256>}, {pipeline_mode = #tpu.pipeline_mode<synchronous>, transform_indices = @transform_3, window_bounds = array<i64: 256, 256>}, {pipeline_mode = #tpu.pipeline_mode<synchronous>, transform_indices = @transform_4, window_bounds = array<i64: 1, 256>}, {pipeline_mode = #tpu.pipeline_mode<synchronous>, transform_indices = @transform_5, window_bounds = array<i64: 256, 256>}, {pipeline_mode = #tpu.pipeline_mode<synchronous>, transform_indices = @transform_6, window_bounds = array<i64: 1, 256>}, {pipeline_mode = #tpu.pipeline_mode<synchronous>, transform_indices = @transform_7, window_bounds = array<i64: 256, 128>}, {pipeline_mode = #tpu.pipeline_mode<synchronous>, transform_indices = @transform_8, window_bounds = array<i64: 1, 128>}, {transform_indices = @transform_9, window_bounds = array<i64: 8, 128>}]} {
    %c0 = arith.constant 0 : index
    %c0_0 = arith.constant 0 : index
    %0 = vector.load %arg1[%c0, %c0_0] : memref<8x16xf32, #tpu.memory_space<vmem>>, vector<8x16xf32>
    %1 = arith.truncf %0 : vector<8x16xf32> to vector<8x16xbf16>
    %c0_1 = arith.constant 0 : index
    %c0_2 = arith.constant 0 : index
    %2 = vector.load %arg2[%c0_1, %c0_2] : memref<16x256xbf16, #tpu.memory_space<vmem>>, vector<16x256xbf16>
    %cst = arith.constant dense<0.000000e+00> : vector<8x256xf32>
    %3 = tpu.matmul %1, %2, %cst {dimension_numbers = #tpu.dot_dimension_numbers<[1], [0], [0], [1], [0, 0, 1, 1], [], []>} : vector<8x16xbf16>, vector<16x256xbf16>, vector<8x256xf32> -> vector<8x256xf32>
    %c0_3 = arith.constant 0 : index
    %c0_4 = arith.constant 0 : index
    %4 = vector.load %arg3[%c0_3, %c0_4] : memref<1x256xf32, #tpu.memory_space<vmem>>, vector<1x256xf32>
    %5 = vector.broadcast %4 : vector<1x256xf32> to vector<8x256xf32>
    %6 = arith.addf %3, %5 : vector<8x256xf32>
    %cst_5 = arith.constant 0.000000e+00 : f32
    %7 = vector.broadcast %cst_5 : f32 to vector<8x256xf32>
    %8 = arith.maximumf %6, %7 : vector<8x256xf32>
    %9 = arith.truncf %8 : vector<8x256xf32> to vector<8x256xbf16>
    %c0_6 = arith.constant 0 : index
    %c0_7 = arith.constant 0 : index
    %10 = vector.load %arg4[%c0_6, %c0_7] : memref<256x256xbf16, #tpu.memory_space<vmem>>, vector<256x256xbf16>
    %cst_8 = arith.constant dense<0.000000e+00> : vector<8x256xf32>
    %11 = tpu.matmul %9, %10, %cst_8 {dimension_numbers = #tpu.dot_dimension_numbers<[1], [0], [0], [1], [0, 0, 1, 1], [], []>} : vector<8x256xbf16>, vector<256x256xbf16>, vector<8x256xf32> -> vector<8x256xf32>
    %c0_9 = arith.constant 0 : index
    %c0_10 = arith.constant 0 : index
    %12 = vector.load %arg5[%c0_9, %c0_10] : memref<1x256xf32, #tpu.memory_space<vmem>>, vector<1x256xf32>
    %13 = vector.broadcast %12 : vector<1x256xf32> to vector<8x256xf32>
    %14 = arith.addf %11, %13 : vector<8x256xf32>
    %cst_11 = arith.constant 0.000000e+00 : f32
    %15 = vector.broadcast %cst_11 : f32 to vector<8x256xf32>
    %16 = arith.maximumf %14, %15 : vector<8x256xf32>
    %17 = arith.truncf %16 : vector<8x256xf32> to vector<8x256xbf16>
    %c0_12 = arith.constant 0 : index
    %c0_13 = arith.constant 0 : index
    %18 = vector.load %arg6[%c0_12, %c0_13] : memref<256x256xbf16, #tpu.memory_space<vmem>>, vector<256x256xbf16>
    %cst_14 = arith.constant dense<0.000000e+00> : vector<8x256xf32>
    %19 = tpu.matmul %17, %18, %cst_14 {dimension_numbers = #tpu.dot_dimension_numbers<[1], [0], [0], [1], [0, 0, 1, 1], [], []>} : vector<8x256xbf16>, vector<256x256xbf16>, vector<8x256xf32> -> vector<8x256xf32>
    %c0_15 = arith.constant 0 : index
    %c0_16 = arith.constant 0 : index
    %20 = vector.load %arg7[%c0_15, %c0_16] : memref<1x256xf32, #tpu.memory_space<vmem>>, vector<1x256xf32>
    %21 = vector.broadcast %20 : vector<1x256xf32> to vector<8x256xf32>
    %22 = arith.addf %19, %21 : vector<8x256xf32>
    %cst_17 = arith.constant 0.000000e+00 : f32
    %23 = vector.broadcast %cst_17 : f32 to vector<8x256xf32>
    %24 = arith.maximumf %22, %23 : vector<8x256xf32>
    %25 = arith.truncf %24 : vector<8x256xf32> to vector<8x256xbf16>
    %c0_18 = arith.constant 0 : index
    %c0_19 = arith.constant 0 : index
    %26 = vector.load %arg8[%c0_18, %c0_19] : memref<256x128xbf16, #tpu.memory_space<vmem>>, vector<256x128xbf16>
    %cst_20 = arith.constant dense<0.000000e+00> : vector<8x128xf32>
    %27 = tpu.matmul %25, %26, %cst_20 {dimension_numbers = #tpu.dot_dimension_numbers<[1], [0], [0], [1], [0, 0, 1, 1], [], []>} : vector<8x256xbf16>, vector<256x128xbf16>, vector<8x128xf32> -> vector<8x128xf32>
    %c0_21 = arith.constant 0 : index
    %c0_22 = arith.constant 0 : index
    %28 = vector.load %arg9[%c0_21, %c0_22] : memref<1x128xf32, #tpu.memory_space<vmem>>, vector<1x128xf32>
    %29 = vector.broadcast %28 : vector<1x128xf32> to vector<8x128xf32>
    %30 = arith.addf %27, %29 : vector<8x128xf32>
    %cst_23 = arith.constant dense<0xFF800000> : vector<8xf32>
    %31 = vector.multi_reduction <maximumf>, %30, %cst_23 [1] : vector<8x128xf32> to vector<8xf32>
    %32 = vector.shape_cast %31 : vector<8xf32> to vector<8x1xf32>
    %33 = vector.broadcast %32 : vector<8x1xf32> to vector<8x128xf32>
    %34 = arith.subf %30, %33 : vector<8x128xf32>
    %35 = math.exp %34 : vector<8x128xf32>
    %cst_24 = arith.constant dense<0.000000e+00> : vector<8xf32>
    %36 = vector.multi_reduction <add>, %35, %cst_24 [1] : vector<8x128xf32> to vector<8xf32>
    %37 = vector.shape_cast %36 : vector<8xf32> to vector<8x1xf32>
    %38 = tpu.reciprocal %37 {approx = true} : vector<8x1xf32> -> vector<8x1xf32>
    %39 = vector.broadcast %38 : vector<8x1xf32> to vector<8x128xf32>
    %40 = arith.mulf %35, %39 : vector<8x128xf32>
    %c0_25 = arith.constant 0 : index
    %c0_26 = arith.constant 0 : index
    %41 = vector.load %arg10[%c0_25, %c0_26] : memref<8x128xf32, #tpu.memory_space<vmem>>, vector<8x128xf32>
    tpu.vector_store %arg10[%c0_25, %c0_26], %40 {strides = array<i32>} : memref<8x128xf32, #tpu.memory_space<vmem>>, vector<8x128xf32>,
    return
  }
  func.func @transform_0(%arg0: i32) -> (i32, i32) {
    %c0_i32 = arith.constant 0 : i32
    %c0_i32_0 = arith.constant 0 : i32
    return %arg0, %c0_i32 : i32, i32
  }
  func.func @transform_1(%arg0: i32) -> (i32, i32) {
    %c0_i32 = arith.constant 0 : i32
    %c0_i32_0 = arith.constant 0 : i32
    %c0_i32_1 = arith.constant 0 : i32
    return %c0_i32, %c0_i32_0 : i32, i32
  }
  func.func @transform_2(%arg0: i32) -> (i32, i32) {
    %c0_i32 = arith.constant 0 : i32
    %c0_i32_0 = arith.constant 0 : i32
    %c0_i32_1 = arith.constant 0 : i32
    return %c0_i32, %c0_i32_0 : i32, i32
  }
  func.func @transform_3(%arg0: i32) -> (i32, i32) {
    %c0_i32 = arith.constant 0 : i32
    %c0_i32_0 = arith.constant 0 : i32
    %c0_i32_1 = arith.constant 0 : i32
    return %c0_i32, %c0_i32_0 : i32, i32
  }
  func.func @transform_4(%arg0: i32) -> (i32, i32) {
    %c0_i32 = arith.constant 0 : i32
    %c0_i32_0 = arith.constant 0 : i32
    %c0_i32_1 = arith.constant 0 : i32
    return %c0_i32, %c0_i32_0 : i32, i32
  }
  func.func @transform_5(%arg0: i32) -> (i32, i32) {
    %c0_i32 = arith.constant 0 : i32
    %c0_i32_0 = arith.constant 0 : i32
    %c0_i32_1 = arith.constant 0 : i32
    return %c0_i32, %c0_i32_0 : i32, i32
  }
  func.func @transform_6(%arg0: i32) -> (i32, i32) {
    %c0_i32 = arith.constant 0 : i32
    %c0_i32_0 = arith.constant 0 : i32
    %c0_i32_1 = arith.constant 0 : i32
    return %c0_i32, %c0_i32_0 : i32, i32
  }
  func.func @transform_7(%arg0: i32) -> (i32, i32) {
    %c0_i32 = arith.constant 0 : i32
    %c0_i32_0 = arith.constant 0 : i32
    %c0_i32_1 = arith.constant 0 : i32
    return %c0_i32, %c0_i32_0 : i32, i32
  }
  func.func @transform_8(%arg0: i32) -> (i32, i32) {
    %c0_i32 = arith.constant 0 : i32
    %c0_i32_0 = arith.constant 0 : i32
    %c0_i32_1 = arith.constant 0 : i32
    return %c0_i32, %c0_i32_0 : i32, i32
  }
  func.func @transform_9(%arg0: i32) -> (i32, i32) {
    %c0_i32 = arith.constant 0 : i32
    %c0_i32_0 = arith.constant 0 : i32
    return %arg0, %c0_i32 : i32, i32
  }
}

</mosaic_0001>

<bundles_post_ra>
// kernel: tpu_custom_call.1
= control target key start
LH: loop header
LB: loop body
LE: loop exit
PB: predicated region body
PF: predicated region fallthrough
CT: control target
= control target key end

     0   :  { %14 = vsyncpa [#allocation3], 0  ;;  %s1415_s0 = inlined_call_operand.hbm [shape: f32[8,16], index: 0, kind: input, shape index: {}]   ;;  %s1416_s1 = inlined_call_operand.hbm [shape: bf16[16,256], index: 1, kind: input, shape index: {}]   ;;  %s1417_s2 = inlined_call_operand.vmem [shape: f32[1,256], index: 2, kind: input, shape index: {}]   ;;  %s1418_s3 = inlined_call_operand.hbm [shape: bf16[256,256], index: 3, kind: input, shape index: {}]   ;;  %s1419_s4 = inlined_call_operand.vmem [shape: f32[1,256], index: 4, kind: input, shape index: {}]   ;;  %s1420_s5 = inlined_call_operand.hbm [shape: bf16[256,256], index: 5, kind: input, shape index: {}]   ;;  %s1421_s6 = inlined_call_operand.vmem [shape: f32[1,256], index: 6, kind: input, shape index: {}]   ;;  %s1422_s7 = inlined_call_operand.hbm [shape: bf16[256,128], index: 7, kind: input, shape index: {}]   ;;  %s1423_s8 = inlined_call_operand.vmem [shape: f32[1,128], index: 8, kind: input, shape index: {}]   ;;  %s1424_s9 = inlined_call_operand.hbm [shape: f32[8,128], index: 9, kind: output, shape index: {}]  }
   0x1   :  { %15 = vsyncpa [#allocation6], 0 }
   0x2   :  { %16 = vsyncpa [#allocation9], 0 }
   0x3   :  { %17 = vsyncpa [#allocation4], 0  ;;  %s1251_s30 = smov [#allocation5]   ;;  %s1111_s13 = scalar_lea.hbm %s1416_s1, 256 }
   0x4   :  { %s33_s10 = sshll.u32 %s1251_s30, 4  ;;  %p1112_p0 = scmp.ne.s32.totalorder %s1416_s1, %s1111_s13  ;;  %s34_s10 = int_to_ptr.vmem [resolvable:$true] %s33_s10 }
   0x5   :  { %p1115_p1 = scmp.lt.u32.totalorder %s1111_s13, %s1416_s1 }
   0x7   :  { %p1117_p2 = pnand %p1115_p1, %p1112_p0 }
   0x9   :  { %1120 = shalt.err (!%p1117_p2)
}
   0xa   :  { %s1121_s18 = scalar_lea.vmem %s34_s10, 256  ;;  %p1126_p4 = scmp.lt.s32.totalorder %s34_s10, %s34_s10 }
   0xb   :  { %p1122_p3 = scmp.ne.s32.totalorder %s34_s10, %s1121_s18  ;;  %p1127_p5 = scmp.lt.s32.totalorder %s1121_s18, %s1121_s18 }
   0xd   :  { %p1128_p6 = por %p1127_p5, %p1126_p4 }
   0xf   :  { %p1129_p7 = pnand %p1128_p6, %p1122_p3 }
  0x11   :  { %1132 = shalt.err (!%p1129_p7)
}
  0x12   :  { %s1252_s19 = smov 128   ;;  %s1253_s20 = smov 8  }
  0x13   :  { %39 = dma.hbm_to_vmem [thread:$0]  %s1416_s1, 256, %s34_s10, [#allocation6], %s1252_s19, %s1252_s19, %s1253_s20  }
  0x14   :  { %s1254_s23 = smov [#allocation8]   ;;  %s1255_s25 = smov [#allocation2]  }
  0x15   :  { %s61_s24 = sshll.u32 %s1254_s23, 4  ;;  %s24_s26 = sshll.u32 %s1255_s25, 4  ;;  %s62_s24 = int_to_ptr.vmem [resolvable:$true] %s61_s24  ;;  %s25_s26 = int_to_ptr.vmem [resolvable:$true] %s24_s26 }
  0x16   :  { %s1133_s29 = scalar_lea.hbm %s1420_s5, 4096 }
  0x17   :  { %p1134_p8 = scmp.ne.s32.totalorder %s1420_s5, %s1133_s29  ;;  %p1137_p9 = scmp.lt.u32.totalorder %s1133_s29, %s1420_s5 }
  0x19   :  { %p1139_p10 = pnand %p1137_p9, %p1134_p8 }
  0x1b   :  { %1142 = shalt.err (!%p1139_p10)
}
  0x1c   :  { %s1143_s1 = scalar_lea.vmem %s62_s24, 4096  ;;  %p1148_p12 = scmp.lt.s32.totalorder %s62_s24, %s62_s24 }
  0x1d   :  { %p1144_p11 = scmp.ne.s32.totalorder %s62_s24, %s1143_s1  ;;  %p1149_p13 = scmp.lt.s32.totalorder %s1143_s1, %s1143_s1 }
  0x1f   :  { %p1150_p0 = por %p1149_p13, %p1148_p12 }
  0x21   :  { %p1151_p1 = pnand %p1150_p0, %p1144_p11 }
  0x23   :  { %1154 = shalt.err (!%p1151_p1)
}
  0x24   :  { %67 = dma.hbm_to_vmem [thread:$0]  %s1420_s5, 4096, %s62_s24, [#allocation9], %s1252_s19, %s1252_s19, %s1253_s20  }
  0x25   :  { %s1155_s17 = scalar_lea.hbm %s1415_s0, 128 }
  0x26   :  { %p1156_p2 = scmp.ne.s32.totalorder %s1415_s0, %s1155_s17  ;;  %p1159_p3 = scmp.lt.u32.totalorder %s1155_s17, %s1415_s0 }
  0x28   :  { %p1161_p4 = pnand %p1159_p3, %p1156_p2 }
  0x2a   :  { %1164 = shalt.err (!%p1161_p4)
}
  0x2b   :  { %s1165_s25 = scalar_lea.vmem %s25_s26, 128  ;;  %p1170_p6 = scmp.lt.s32.totalorder %s25_s26, %s25_s26 }
  0x2c   :  { %p1166_p5 = scmp.ne.s32.totalorder %s25_s26, %s1165_s25  ;;  %p1171_p7 = scmp.lt.s32.totalorder %s1165_s25, %s1165_s25 }
  0x2e   :  { %p1172_p8 = por %p1171_p7, %p1170_p6 }
  0x30   :  { %p1173_p9 = pnand %p1172_p8, %p1166_p5 }
  0x32   :  { %1176 = shalt.err (!%p1173_p9)
}
  0x33   :  { %27 = dma.hbm_to_vmem [thread:$0]  %s1415_s0, 128, %s25_s26, [#allocation3]  }
  0x34   :  { %s1256_s27 = smov [#allocation7]   ;;  %s1257_s29 = smov [#allocation10]  }
  0x35   :  { %s47_s28 = sshll.u32 %s1256_s27, 4  ;;  %s75_s30 = sshll.u32 %s1257_s29, 4  ;;  %s48_s28 = int_to_ptr.vmem [resolvable:$true] %s47_s28  ;;  %s76_s30 = int_to_ptr.vmem [resolvable:$true] %s75_s30 }
  0x36   :  { %s1177_s13 = scalar_lea.hbm %s1418_s3, 4096 }
  0x37   :  { %p1178_p10 = scmp.ne.s32.totalorder %s1418_s3, %s1177_s13  ;;  %p1181_p11 = scmp.lt.u32.totalorder %s1177_s13, %s1418_s3 }
  0x39   :  { %p1183_p12 = pnand %p1181_p11, %p1178_p10 }
  0x3b   :  { %1186 = shalt.err (!%p1183_p12)
}
  0x3c   :  { %s1187_s0 = scalar_lea.vmem %s48_s28, 4096  ;;  %p1192_p0 = scmp.lt.s32.totalorder %s48_s28, %s48_s28 }
  0x3d   :  { %p1188_p13 = scmp.ne.s32.totalorder %s48_s28, %s1187_s0  ;;  %p1193_p1 = scmp.lt.s32.totalorder %s1187_s0, %s1187_s0 }
  0x3f   :  { %p1194_p2 = por %p1193_p1, %p1192_p0 }
  0x41   :  { %p1195_p3 = pnand %p1194_p2, %p1188_p13 }
  0x43   :  { %1198 = shalt.err (!%p1195_p3)
}
  0x44   :  { %53 = dma.hbm_to_vmem [thread:$0]  %s1418_s3, 4096, %s48_s28, [#allocation6], %s1252_s19, %s1252_s19, %s1253_s20  }
  0x45   :  { %s1199_s21 = scalar_lea.hbm %s1422_s7, 2048 }
  0x46   :  { %p1200_p4 = scmp.ne.s32.totalorder %s1422_s7, %s1199_s21  ;;  %p1203_p5 = scmp.lt.u32.totalorder %s1199_s21, %s1422_s7 }
  0x48   :  { %p1205_p6 = pnand %p1203_p5, %p1200_p4 }
  0x4a   :  { %1208 = shalt.err (!%p1205_p6)
}
  0x4b   :  { %s1209_s24 = scalar_lea.vmem %s76_s30, 2048  ;;  %p1214_p8 = scmp.lt.s32.totalorder %s76_s30, %s76_s30 }
  0x4c   :  { %p1210_p7 = scmp.ne.s32.totalorder %s76_s30, %s1209_s24  ;;  %p1215_p9 = scmp.lt.s32.totalorder %s1209_s24, %s1209_s24 }
  0x4e   :  { %p1216_p10 = por %p1215_p9, %p1214_p8 }
  0x50   :  { %p1217_p11 = pnand %p1216_p10, %p1210_p7 }
  0x52   :  { %1220 = shalt.err (!%p1217_p11)
}
  0x53   :  { %s1258_s3 = smov 64   ;;  %s1259_s19 = smov 4  }
  0x54   :  { %81 = dma.hbm_to_vmem [thread:$0]  %s1422_s7, 2048, %s76_s30, [#allocation9], %s1258_s3, %s1258_s3, %s1259_s19  }
  0x55   :  { %1243 = dma.done.wait [#allocation3], 128  }
  0x56   :  { %1244 = vsyncadd [#allocation3], 4294967168 }
  0x57   :  { %1245 = dma.done.wait [#allocation6], 4352  }
  0x58   :  { %1246 = vsyncadd [#allocation6], 4294962944 }
  0x59   :  { %1247 = dma.done.wait [#allocation9], 6144  }
  0x5a   :  { %1248 = vsyncadd [#allocation9], 4294961152  ;;  %v1260_v0 = vmov 0   ;;  %v992_v1 = vld [vmem:[#allocation5 + $0x4] ss:$8 sps:$4 sm:$0xff]   ;;  %v100_v3 = vld [vmem:[#allocation2] sm:$0xff] }
  0x5b   :  { %162 = vmatprep.mubr.bf16.mxu0 %v1260_v0  ;;  %v994_v2 = vld [vmem:[#allocation5] ss:$8 sps:$4 sm:$0xff]   ;;  %130 = vmatprep.subr.bf16.mxu0 %v992_v1  ;;  %v101_v4 = vpack.c.bf16 %v100_v3, %v100_v3  ;;  %v995_v5 = vld [vmem:[#allocation7 + $0x4] ss:$8 sps:$4 sm:$0xff]   ;;  %v997_v6 = vld [vmem:[#allocation7] ss:$8 sps:$4 sm:$0xff]   ;;  %v106_v1 = vlaneseq }
  0x5c   :  { %131 = vmatpush1.bf16.msra.mxu0 %v994_v2  ;;  %vm126_vm0 = vcmask 130048   ;;  %v998_v7 = vld [vmem:[#allocation7 + $0x14] ss:$8 sps:$4 sm:$0xff]   ;;  %379 = vmatprep.subr.bf16.mxu1 %v995_v5  ;;  %v1000_v8 = vld [vmem:[#allocation7 + $0x10] ss:$8 sps:$4 sm:$0xff]   ;;  %s1261_s12 = smov [#allocation11]  }
  0x5d   :  { %380 = vmatpush1.bf16.msra.mxu1 %v997_v6  ;;  %v1001_v9 = vld [vmem:[#allocation7 + $0x24] ss:$8 sps:$4 sm:$0xff]   ;;  %v1003_v10 = vld [vmem:[#allocation7 + $0x20] ss:$8 sps:$4 sm:$0xff]   ;;  %v1004_v11 = vld [vmem:[#allocation7 + $0x34] ss:$8 sps:$4 sm:$0xff]  }
  0x5e   :  { %381 = vmatprep.subr.bf16.mxu1 %v998_v7  ;;  %v1006_v12 = vld [vmem:[#allocation7 + $0x30] ss:$8 sps:$4 sm:$0xff]   ;;  %v1007_v13 = vld [vmem:[#allocation7 + $0x44] ss:$8 sps:$4 sm:$0xff]   ;;  %v1009_v14 = vld [vmem:[#allocation7 + $0x40] ss:$8 sps:$4 sm:$0xff]  }
  0x5f   :  { %877 = vmatmul.mubr.msk.bf16.vlgmr.msra.gmra.mrb[0].mxu0 %vm126_vm0, %v101_v4  ;;  %v1010_v15 = vld [vmem:[#allocation7 + $0x54] ss:$8 sps:$4 sm:$0xff]   ;;  %v1012_v16 = vld [vmem:[#allocation7 + $0x50] ss:$8 sps:$4 sm:$0xff]   ;;  %v1013_v17 = vld [vmem:[#allocation7 + $0x64] ss:$8 sps:$4 sm:$0xff]  }
  0x60   :  { %v1015_v18 = vld [vmem:[#allocation7 + $0x60] ss:$8 sps:$4 sm:$0xff]   ;;  %v1016_v19 = vld [vmem:[#allocation7 + $0x74] ss:$8 sps:$4 sm:$0xff]   ;;  %v1018_v20 = vld [vmem:[#allocation7 + $0x70] ss:$8 sps:$4 sm:$0xff]  }
  0x61   :  { %382 = vmatpush1.bf16.msra.mxu1 %v1000_v8  ;;  %v1019_v21 = vld [vmem:[#allocation7 + $0x84] ss:$8 sps:$4 sm:$0xff]   ;;  %v1021_v22 = vld [vmem:[#allocation7 + $0x80] ss:$8 sps:$4 sm:$0xff]   ;;  %v1022_v23 = vld [vmem:[#allocation7 + $0x94] ss:$8 sps:$4 sm:$0xff]  }
  0x62   :  { %383 = vmatprep.subr.bf16.mxu1 %v1001_v9  ;;  %v1024_v24 = vld [vmem:[#allocation7 + $0x90] ss:$8 sps:$4 sm:$0xff]   ;;  %v1025_v25 = vld [vmem:[#allocation7 + $0xa4] ss:$8 sps:$4 sm:$0xff]   ;;  %v1027_v26 = vld [vmem:[#allocation7 + $0xa0] ss:$8 sps:$4 sm:$0xff]  }
  0x63   :  { %v1028_v27 = vld [vmem:[#allocation7 + $0xb4] ss:$8 sps:$4 sm:$0xff]   ;;  %v1030_v28 = vld [vmem:[#allocation7 + $0xb0] ss:$8 sps:$4 sm:$0xff]   ;;  %v1031_v29 = vld [vmem:[#allocation7 + $0xc4] ss:$8 sps:$4 sm:$0xff]  }
  0x64   :  { %v1033_v30 = vld [vmem:[#allocation7 + $0xc0] ss:$8 sps:$4 sm:$0xff]   ;;  %v1034_v31 = vld [vmem:[#allocation7 + $0xd4] ss:$8 sps:$4 sm:$0xff]   ;;  %v1036_v32 = vld [vmem:[#allocation7 + $0xd0] ss:$8 sps:$4 sm:$0xff]  }
  0x65   :  { %384 = vmatpush1.bf16.msra.mxu1 %v1003_v10  ;;  %v1037_v33 = vld [vmem:[#allocation7 + $0xe4] ss:$8 sps:$4 sm:$0xff]   ;;  %v1039_v34 = vld [vmem:[#allocation7 + $0xe0] ss:$8 sps:$4 sm:$0xff]   ;;  %v1040_v35 = vld [vmem:[#allocation7 + $0xf4] ss:$8 sps:$4 sm:$0xff]  }
  0x66   :  { %385 = vmatprep.subr.bf16.mxu1 %v1004_v11  ;;  %v1042_v36 = vld [vmem:[#allocation7 + $0xf0] ss:$8 sps:$4 sm:$0xff]   ;;  %v1043_v37 = vld [vmem:[#allocation8] ss:$8 sps:$4 sm:$0xff]   ;;  %v1045_v38 = vld [vmem:[#allocation8 + $0x4] ss:$8 sps:$4 sm:$0xff]  }
  0x67   :  { %v1048_v39 = vld [vmem:[#allocation8 + $0x14] ss:$8 sps:$4 sm:$0xff]   ;;  %628 = vmatprep.subr.bf16.mxu0 %v1045_v38  ;;  %v1046_v40 = vld [vmem:[#allocation8 + $0x10] ss:$8 sps:$4 sm:$0xff]   ;;  %v1051_v41 = vld [vmem:[#allocation8 + $0x24] ss:$8 sps:$4 sm:$0xff]  }
  0x68   :  { %629 = vmatpush1.bf16.msra.mxu0 %v1043_v37  ;;  %v1049_v42 = vld [vmem:[#allocation8 + $0x20] ss:$8 sps:$4 sm:$0xff]   ;;  %v1054_v43 = vld [vmem:[#allocation8 + $0x34] ss:$8 sps:$4 sm:$0xff]   ;;  %v1052_v44 = vld [vmem:[#allocation8 + $0x30] ss:$8 sps:$4 sm:$0xff]  }
  0x69   :  { %386 = vmatpush1.bf16.msra.mxu1 %v1006_v12  ;;  %630 = vmatprep.subr.bf16.mxu0 %v1048_v39  ;;  %v1057_v45 = vld [vmem:[#allocation8 + $0x44] ss:$8 sps:$4 sm:$0xff]   ;;  %v1055_v46 = vld [vmem:[#allocation8 + $0x40] ss:$8 sps:$4 sm:$0xff]   ;;  %v1060_v47 = vld [vmem:[#allocation8 + $0x54] ss:$8 sps:$4 sm:$0xff]  }
  0x6a   :  { %387 = vmatprep.subr.bf16.mxu1 %v1007_v13  ;;  %v1058_v48 = vld [vmem:[#allocation8 + $0x50] ss:$8 sps:$4 sm:$0xff]   ;;  %v1063_v49 = vld [vmem:[#allocation8 + $0x64] ss:$8 sps:$4 sm:$0xff]   ;;  %v1061_v50 = vld [vmem:[#allocation8 + $0x60] ss:$8 sps:$4 sm:$0xff]  }
  0x6b   :  { %v1066_v51 = vld [vmem:[#allocation8 + $0x74] ss:$8 sps:$4 sm:$0xff]   ;;  %v1064_v52 = vld [vmem:[#allocation8 + $0x70] ss:$8 sps:$4 sm:$0xff]   ;;  %v1069_v53 = vld [vmem:[#allocation8 + $0x84] ss:$8 sps:$4 sm:$0xff]  }
  0x6c   :  { %631 = vmatpush1.bf16.msra.mxu0 %v1046_v40  ;;  %v1067_v54 = vld [vmem:[#allocation8 + $0x80] ss:$8 sps:$4 sm:$0xff]   ;;  %v1072_v55 = vld [vmem:[#allocation8 + $0x94] ss:$8 sps:$4 sm:$0xff]   ;;  %v1070_v56 = vld [vmem:[#allocation8 + $0x90] ss:$8 sps:$4 sm:$0xff]  }
  0x6d   :  { %388 = vmatpush1.bf16.msra.mxu1 %v1009_v14  ;;  %632 = vmatprep.subr.bf16.mxu0 %v1051_v41  ;;  %v1075_v57 = vld [vmem:[#allocation8 + $0xa4] ss:$8 sps:$4 sm:$0xff]   ;;  %v1073_v58 = vld [vmem:[#allocation8 + $0xa0] ss:$8 sps:$4 sm:$0xff]   ;;  %v1078_v59 = vld [vmem:[#allocation8 + $0xb4] ss:$8 sps:$4 sm:$0xff]  }
  0x6e   :  { %389 = vmatprep.subr.bf16.mxu1 %v1010_v15  ;;  %v1076_v60 = vld [vmem:[#allocation8 + $0xb0] ss:$8 sps:$4 sm:$0xff]   ;;  %v1081_v61 = vld [vmem:[#allocation8 + $0xc4] ss:$8 sps:$4 sm:$0xff]   ;;  %v1079_v62 = vld [vmem:[#allocation8 + $0xc0] ss:$8 sps:$4 sm:$0xff]  }
  0x6f   :  { %v1084_v63 = vld [vmem:[#allocation8 + $0xd4] ss:$8 sps:$4 sm:$0xff]   ;;  %v1082_v0 = vld [vmem:[#allocation8 + $0xd0] ss:$8 sps:$4 sm:$0xff]   ;;  %v107_v2 = vshrl.u32 %v106_v1, 7  ;;  %s864_s13 = sshll.u32 %s1261_s12, 4  ;;  %s865_s13 = int_to_ptr.vmem [resolvable:$true] %s864_s13 }
  0x70   :  { %633 = vmatpush1.bf16.msra.mxu0 %v1049_v42  ;;  %v104_v4 = vld [vmem:[%s1417_s2] sm:$0x3]  ;;  %p1226_p13 = scmp.lt.s32.totalorder %s865_s13, %s865_s13 }
  0x71   :  { %390 = vmatpush1.bf16.msra.mxu1 %v1012_v16  ;;  %634 = vmatprep.subr.bf16.mxu0 %v1054_v43  ;;  %v1381_v3 = vsub.s32 0, %v107_v2  ;;  %v1386_v5 = vsub.s32 1, %v107_v2  ;;  %v942_v2 = vld [vmem:[%s1423_s8] ss:$0 sm:$0xff]  ;;  %s1221_s8 = scalar_lea.vmem %s865_s13, 128 }
  0x72   :  { %391 = vmatprep.subr.bf16.mxu1 %v1013_v17  ;;  %p1222_p12 = scmp.ne.s32.totalorder %s865_s13, %s1221_s8  ;;  %p1227_p0 = scmp.lt.s32.totalorder %s1221_s8, %s1221_s8 }
  0x73   :  { %v109_v6 = vrot.slane %v104_v4, %v1381_v3  ;;  %v113_v7 = vrot.slane %v104_v4, %v1386_v5 }
  0x74   :  { %635 = vmatpush1.bf16.msra.mxu0 %v1052_v44  ;;  %p1228_p1 = por %p1227_p0, %p1226_p13 }
  0x75   :  { %392 = vmatpush1.bf16.msra.mxu1 %v1015_v18  ;;  %636 = vmatprep.subr.bf16.mxu0 %v1057_v45  ;;  %v1087_v18 = vld [vmem:[#allocation8 + $0xe4] ss:$8 sps:$4 sm:$0xff]  }
  0x76   :  { %393 = vmatprep.subr.bf16.mxu1 %v1016_v19  ;;  %v1085_v19 = vld [vmem:[#allocation8 + $0xe0] ss:$8 sps:$4 sm:$0xff]   ;;  %p1229_p2 = pnand %p1228_p1, %p1222_p12 }
  0x78   :  { %637 = vmatpush1.bf16.msra.mxu0 %v1055_v46 }
  0x79   :  { %394 = vmatpush1.bf16.msra.mxu1 %v1018_v20  ;;  %638 = vmatprep.subr.bf16.mxu0 %v1060_v47  ;;  %v1090_v20 = vld [vmem:[#allocation8 + $0xf4] ss:$8 sps:$4 sm:$0xff]  }
  0x7a   :  { %395 = vmatprep.subr.bf16.mxu1 %v1019_v21  ;;  %v1088_v21 = vld [vmem:[#allocation8 + $0xf0] ss:$8 sps:$4 sm:$0xff]  }
  0x7b   :  { %v1103_v47 = vld [vmem:[#allocation10 + $0x70] sm:$0xff]  }
  0x7c   :  { %639 = vmatpush1.bf16.msra.mxu0 %v1058_v48  ;;  %v1104_v48 = vld [vmem:[#allocation10 + $0x30] sm:$0xff]  }
  0x7d   :  { %396 = vmatpush1.bf16.msra.mxu1 %v1021_v22  ;;  %640 = vmatprep.subr.bf16.mxu0 %v1063_v49  ;;  %v1091_v22 = vld [vmem:[#allocation10 + $0x40] sm:$0xff]   ;;  %v1105_v49 = vld [vmem:[#allocation10 + $0x78] sm:$0xff]  }
  0x7e   :  { %397 = vmatprep.subr.bf16.mxu1 %v1022_v23  ;;  %v1092_v23 = vld [vmem:[#allocation10] sm:$0xff]  }
  0x80   :  { %641 = vmatpush1.bf16.msra.mxu0 %v1061_v50  ;;  %v1106_v50 = vld [vmem:[#allocation10 + $0x38] sm:$0xff]  }
  0x81   :  { %398 = vmatpush1.bf16.msra.mxu1 %v1024_v24  ;;  %642 = vmatprep.subr.bf16.mxu0 %v1066_v51  ;;  %v1093_v24 = vld [vmem:[#allocation10 + $0x48] sm:$0xff]  }
  0x82   :  { %399 = vmatprep.subr.bf16.mxu1 %v1025_v25  ;;  %v1094_v25 = vld [vmem:[#allocation10 + $0x8] sm:$0xff]  }
  0x83   :  { %v456_v51 = vld [vmem:[%s1421_s6] sm:$0x3] }
  0x84   :  { %643 = vmatpush1.bf16.msra.mxu0 %v1064_v52  ;;  %v461_v52 = vrot.slane %v456_v51, %v1381_v3 }
  0x85   :  { %400 = vmatpush1.bf16.msra.mxu1 %v1027_v26  ;;  %644 = vmatprep.subr.bf16.mxu0 %v1069_v53  ;;  %v1095_v26 = vld [vmem:[#allocation10 + $0x50] sm:$0xff]   ;;  %v465_v53 = vrot.slane %v456_v51, %v1386_v5 }
  0x86   :  { %401 = vmatprep.subr.bf16.mxu1 %v1028_v27  ;;  %v1096_v27 = vld [vmem:[#allocation10 + $0x10] sm:$0xff]  }
  0x88   :  { %645 = vmatpush1.bf16.msra.mxu0 %v1067_v54 }
  0x89   :  { %402 = vmatpush1.bf16.msra.mxu1 %v1030_v28  ;;  %646 = vmatprep.subr.bf16.mxu0 %v1072_v55  ;;  %v1097_v28 = vld [vmem:[#allocation10 + $0x58] sm:$0xff]  }
  0x8a   :  { %403 = vmatprep.subr.bf16.mxu1 %v1031_v29  ;;  %v1098_v29 = vld [vmem:[#allocation10 + $0x18] sm:$0xff]  }
  0x8c   :  { %647 = vmatpush1.bf16.msra.mxu0 %v1070_v56 }
  0x8d   :  { %404 = vmatpush1.bf16.msra.mxu1 %v1033_v30  ;;  %648 = vmatprep.subr.bf16.mxu0 %v1075_v57  ;;  %v1099_v30 = vld [vmem:[#allocation10 + $0x60] sm:$0xff]  }
  0x8e   :  { %405 = vmatprep.subr.bf16.mxu1 %v1034_v31  ;;  %v1100_v31 = vld [vmem:[#allocation10 + $0x20] sm:$0xff]  }
  0x90   :  { %649 = vmatpush1.bf16.msra.mxu0 %v1073_v58 }
  0x91   :  { %406 = vmatpush1.bf16.msra.mxu1 %v1036_v32  ;;  %650 = vmatprep.subr.bf16.mxu0 %v1078_v59  ;;  %v1101_v32 = vld [vmem:[#allocation10 + $0x68] sm:$0xff]  }
  0x92   :  { %407 = vmatprep.subr.bf16.mxu1 %v1037_v33  ;;  %v1102_v33 = vld [vmem:[#allocation10 + $0x28] sm:$0xff]  }
  0x94   :  { %651 = vmatpush1.bf16.msra.mxu0 %v1076_v60 }
  0x95   :  { %408 = vmatpush1.bf16.msra.mxu1 %v1039_v34  ;;  %652 = vmatprep.subr.bf16.mxu0 %v1081_v61  ;;  %v207_v34 = vld [vmem:[%s1419_s4] sm:$0x3] }
  0x96   :  { %409 = vmatprep.subr.bf16.mxu1 %v1040_v35  ;;  %v212_v35 = vrot.slane %v207_v34, %v1381_v3 }
  0x98   :  { %653 = vmatpush1.bf16.msra.mxu0 %v1079_v62 }
  0x99   :  { %410 = vmatpush1.bf16.msra.mxu1 %v1042_v36  ;;  %654 = vmatprep.subr.bf16.mxu0 %v1084_v63  ;;  %v216_v36 = vrot.slane %v207_v34, %v1386_v5 }
  0x9a   :  { %959 = vmatprep.subr.bf16.mxu1 %v1091_v22 }
  0x9c   :  { %655 = vmatpush1.bf16.msra.mxu0 %v1082_v0 }
  0x9d   :  { %656 = vmatprep.subr.bf16.mxu0 %v1087_v18 }
  0xa0   :  { %657 = vmatpush1.bf16.msra.mxu0 %v1085_v19 }
  0xa1   :  { %658 = vmatprep.subr.bf16.mxu0 %v1090_v20 }
  0xa4   :  { %659 = vmatpush1.bf16.msra.mxu0 %v1088_v21 }
 0x132   :  { %v164_v8 = vpop.f32.mrb[0].mxu0 }
 0x133   :  { %v165_v9 = vadd.f32 %v164_v8, %v109_v6  ;;  %v166_v10 = vpop.f32.mrb[1].mxu0 }
 0x134   :  { %v167_v11 = vadd.f32 %v166_v10, %v113_v7  ;;  %v168_v12 = vpop.f32.mrb[2].mxu0 }
 0x135   :  { %v171_v13 = vmax.f32 %v165_v9, 0.0  ;;  %v169_v14 = vpop.f32.mrb[3].mxu0 }
 0x136   :  { %v172_v15 = vmax.f32 %v167_v11, 0.0 }
 0x137   :  { %v173_v17 = vpack.c.bf16 %v171_v13, %v171_v13 }
 0x138   :  { %v174_v16 = vpack.c.bf16 %v172_v15, %v172_v15 }
 0x13a   :  { %411 = vmatprep.mubr.bf16.mxu1 %v174_v16 }
 0x13b   :  { %412 = vmatmul.mubr.bf16.vlgmr.msra.gmra.mrb[0].mxu1 %v173_v17 }
 0x13c   :  { %960 = vmatpush3.bf16.msra.mxu1 %v1092_v23 }
 0x13d   :  { %961 = vmatprep.subr.bf16.mxu1 %v1093_v24 }
 0x140   :  { %962 = vmatpush3.bf16.msra.mxu1 %v1094_v25 }
 0x141   :  { %963 = vmatprep.subr.bf16.mxu1 %v1095_v26 }
 0x144   :  { %964 = vmatpush3.bf16.msra.mxu1 %v1096_v27 }
 0x145   :  { %965 = vmatprep.subr.bf16.mxu1 %v1097_v28 }
 0x148   :  { %966 = vmatpush3.bf16.msra.mxu1 %v1098_v29 }
 0x149   :  { %967 = vmatprep.subr.bf16.mxu1 %v1099_v30 }
 0x14c   :  { %968 = vmatpush3.bf16.msra.mxu1 %v1100_v31 }
 0x14d   :  { %969 = vmatprep.subr.bf16.mxu1 %v1101_v32 }
 0x150   :  { %970 = vmatpush3.bf16.msra.mxu1 %v1102_v33 }
 0x151   :  { %971 = vmatprep.subr.bf16.mxu1 %v1103_v47 }
 0x154   :  { %972 = vmatpush3.bf16.msra.mxu1 %v1104_v48 }
 0x155   :  { %973 = vmatprep.subr.bf16.mxu1 %v1105_v49 }
 0x158   :  { %974 = vmatpush3.bf16.msra.mxu1 %v1106_v50 }
 0x20e   :  { %v413_v37 = vpop.f32.mrb[0].mxu1 }
 0x20f   :  { %v414_v38 = vadd.f32 %v413_v37, %v212_v35  ;;  %v415_v39 = vpop.f32.mrb[1].mxu1 }
 0x210   :  { %v416_v40 = vadd.f32 %v415_v39, %v216_v36  ;;  %v417_v41 = vpop.f32.mrb[2].mxu1 }
 0x211   :  { %v420_v42 = vmax.f32 %v414_v38, 0.0  ;;  %v418_v43 = vpop.f32.mrb[3].mxu1 }
 0x212   :  { %v421_v44 = vmax.f32 %v416_v40, 0.0 }
 0x213   :  { %v422_v46 = vpack.c.bf16 %v420_v42, %v420_v42 }
 0x214   :  { %v423_v45 = vpack.c.bf16 %v421_v44, %v421_v44 }
 0x216   :  { %660 = vmatprep.mubr.bf16.mxu0 %v423_v45 }
 0x217   :  { %661 = vmatmul.mubr.bf16.vlgmr.msra.gmra.mrb[4].mxu0 %v422_v46 }
 0x2ea   :  { %v662_v54 = vpop.f32.mrb[4].mxu0 }
 0x2eb   :  { %v663_v55 = vadd.f32 %v662_v54, %v461_v52  ;;  %v664_v56 = vpop.f32.mrb[5].mxu0 }
 0x2ec   :  { %v665_v57 = vadd.f32 %v664_v56, %v465_v53  ;;  %v666_v58 = vpop.f32.mrb[6].mxu0 }
 0x2ed   :  { %v669_v59 = vmax.f32 %v663_v55, 0.0  ;;  %v667_v60 = vpop.f32.mrb[7].mxu0 }
 0x2ee   :  { %v670_v61 = vmax.f32 %v665_v57, 0.0 }
 0x2ef   :  { %v671_v63 = vpack.c.bf16 %v669_v59, %v669_v59 }
 0x2f0   :  { %v672_v62 = vpack.c.bf16 %v670_v61, %v670_v61 }
 0x2f2   :  { %840 = vmatprep.mubr.bf16.mxu1 %v672_v62 }
 0x2f3   :  { %841 = vmatmul.mubr.bf16.vlgmr.msra.gmra.mrb[4].mxu1 %v671_v63 }
 0x3c6   :  { %v975_v0 = vpop.f32.mrb[4].mxu1 }
 0x3c7   :  { %v976_v1 = vpop.f32.mrb[5].mxu1 }
 0x3c8   :  { %v977_v3 = vadd.f32 %v976_v1, %v975_v0  ;;  %v978_v4 = vpop.f32.mrb[6].mxu1 }
 0x3c9   :  { %v979_v5 = vpop.f32.mrb[7].mxu1 }
 0x3ca   :  { %v843_v6 = vadd.f32 %v977_v3, %v942_v2 }
 0x3cc   :  { %848 = vmax.xlane.f32.xlu0 %v843_v6 }
 0x459   :  { %v849_v7 = vpop.xlane.xlu0 %848 }
 0x45a   :  { %v850_v8 = vsub.f32 %v843_v6, %v849_v7 }
 0x45c   :  { %v851_v9 = vmul.f32 1.442695, %v850_v8 }
 0x45e   :  { %1107 = vpow2.f32 %v851_v9 }
 0x468   :  { %v1108_v10 = vpop.eup %1107 }
 0x469   :  { %853 = vadd.xlane.f32.xlu0 %v1108_v10 }
 0x4f6   :  { %v854_v11 = vpop.xlane.xlu0 %853 }
 0x4f7   :  { %1109 = vrcp.f32 %v854_v11 }
 0x501   :  { %v1110_v12 = vpop.eup %1109 }
 0x502   :  { %v856_v13 = vmul.f32 %v1110_v12, %v1108_v10 }
 0x504   :  { %857 = vst [vmem:[#allocation11] sm:$0xff] %v856_v13 }
 0x505   :  { %1232 = shalt.err (!%p1229_p2)
}
 0x506   :  { %s1233_s14 = scalar_lea.hbm %s1424_s9, 128 }
 0x507   :  { %p1234_p3 = scmp.ne.s32.totalorder %s1424_s9, %s1233_s14  ;;  %p1237_p4 = scmp.lt.u32.totalorder %s1233_s14, %s1424_s9 }
 0x509   :  { %p1239_p5 = pnand %p1237_p4, %p1234_p3 }
 0x50b   :  { %1242 = shalt.err (!%p1239_p5)
}
 0x50c   :  { %867 = dma.vmem_to_hbm [thread:$0]  %s865_s13, 128, %s1424_s9, [#allocation4]  }
 0x50d   :  { %1249 = dma.done.wait [#allocation4], 128  }
 0x50e   :  { %1250 = vsyncadd [#allocation4], 4294967168 }
 0x50f   :  { %871 = vsyncpa [#allocation3], 1 }
 0x510   :  { %872 = vsyncpa [#allocation6], 1 }
 0x511   :  { %873 = vsyncpa [#allocation9], 1 }
 0x512   :  { %874 = vsyncpa [#allocation4], 1 }

</bundles_post_ra>
